<compile_context>
chip_gen: v7x
topology: tpu7x:2x2x1
jax: 0.10.0
libtpu: 0.0.40
codegen_flags: <defaults>
</compile_context>

<pallas_src>
import numpy as np
import jax
import jax.numpy as jnp
from jax.experimental import pallas as pl
from jax.experimental.pallas import tpu as pltpu


def _decoder_step_kernel(x_ref, h_ref, c_ref,          # activations
                         wg_ref, bg_ref,               # fused LSTM weights
                         wout_ref, bout_ref,           # projection tile
                         logp_ref, hout_ref, cout_ref,  # outputs
                         h_scr, m_scr, l_scr):         # scratch
    """Grid = (batch_tiles [parallel], V_tiles [arbitrary]).

    V-tile 0: tanh(emb) -> fused LSTM cell -> stash h_new, init online LSE.
    Every V-tile: logits tile = h_new @ w_out_tile + b_out_tile, stash raw
                  logits into the VMEM-resident logp slab, update (m, l).
    Last V-tile: logp = logits - (m + log(l))   (global log-softmax).
    """
    j = pl.program_id(1)
    n_v = pl.num_programs(1)
    H = h_ref.shape[-1]
    tile_v = wout_ref.shape[-1]

    # ---- first V tile of this batch tile: run the LSTM cell once ----------
    @pl.when(j == 0)
    def _():
        x = jnp.tanh(x_ref[...])                       # nn.Tanh on embedding
        h = h_ref[...]
        c = c_ref[...]
        # one fused, lane-dense gate matmul: [N, E+H] @ [E+H, 4H]
        xh = jnp.concatenate([x, h], axis=-1).astype(jnp.bfloat16)
        gates = (jnp.dot(xh, wg_ref[...], preferred_element_type=jnp.float32)
                 + bg_ref[...])                        # [N, 4H], f32
        i_g = jax.nn.sigmoid(gates[:, 0 * H:1 * H])
        f_g = jax.nn.sigmoid(gates[:, 1 * H:2 * H])
        g_g = jnp.tanh(gates[:, 2 * H:3 * H])
        o_g = jax.nn.sigmoid(gates[:, 3 * H:4 * H])
        c_new = f_g * c + i_g * g_g
        h_new = o_g * jnp.tanh(c_new)
        h_scr[...] = h_new
        hout_ref[...] = h_new
        cout_ref[...] = c_new
        m_scr[...] = jnp.full_like(m_scr, -jnp.inf)
        l_scr[...] = jnp.zeros_like(l_scr)

    # ---- output projection for this V tile (weight-streaming GEMM) --------
    h_bf = h_scr[...].astype(jnp.bfloat16)
    logits = (jnp.dot(h_bf, wout_ref[...], preferred_element_type=jnp.float32)
              + bout_ref[...])                         # [N, TILE_V], f32

    # online max / sum-exp accumulation across V tiles
    m_prev = m_scr[...]
    m_new = jnp.maximum(m_prev, jnp.max(logits, axis=-1, keepdims=True))
    l_scr[...] = (l_scr[...] * jnp.exp(m_prev - m_new)
                  + jnp.sum(jnp.exp(logits - m_new), axis=-1, keepdims=True))
    m_scr[...] = m_new

    # stash raw logits into the VMEM-resident output slab (lane-aligned)
    v0 = pl.multiple_of(j * tile_v, 128)
    logp_ref[:, pl.ds(v0, tile_v)] = logits

    # ---- last V tile: normalize the whole slab with the global LSE --------
    @pl.when(j == n_v - 1)
    def _():
        lse = m_scr[...] + jnp.log(l_scr[...])
        logp_ref[...] = logp_ref[...] - lse


def init_params(key, embedding_size, hidden_size, output_size):
    E, H, V = embedding_size, hidden_size, output_size
    ks = jax.random.split(key, 8)
    bound = 1.0 / float(H) ** 0.5
    # nn.LSTM(E, H): W_ih [4H,E], W_hh [4H,H] -> fused, transposed [E+H, 4H],
    # gate order (i, f, g, o) along the 4H (lane) axis.
    w_ih = jax.random.uniform(ks[1], (E, 4 * H), jnp.float32, -bound, bound)
    w_hh = jax.random.uniform(ks[2], (H, 4 * H), jnp.float32, -bound, bound)
    b_ih = jax.random.uniform(ks[3], (1, 4 * H), jnp.float32, -bound, bound)
    b_hh = jax.random.uniform(ks[4], (1, 4 * H), jnp.float32, -bound, bound)
    params = {
        # nn.Embedding(output_size, embedding_size)
        "embedding": jax.random.normal(ks[0], (V, E), jnp.float32),
        # fused LSTM weights (bf16 storage, f32 accumulation in-kernel)
        "w_gates": jnp.concatenate([w_ih, w_hh], axis=0).astype(jnp.bfloat16),
        "b_gates": b_ih + b_hh,                                  # f32 [1, 4H]
        # nn.Linear(H, V): W [V,H] -> stored transposed [H,V], bf16 (streamed)
        "w_out": jax.random.uniform(ks[5], (H, V), jnp.float32,
                                    -bound, bound).astype(jnp.bfloat16),
        "b_out": jax.random.uniform(ks[6], (1, V), jnp.float32, -bound, bound),
    }
    return params


def decoder_rnn_forward(inp, hidden, cell, params, *, tile_v=256):
    """Mirrors DecoderRNN.forward.

    Args:
      inp:    int32 [N] token ids
      hidden: f32   [1, N, H]
      cell:   f32   [1, N, H]
    Returns:
      (log_probs [N, V], h_final [1, N, H], c_final [1, N, H])
    """
    # Embedding lookup is a data-dependent gather -> plain-JAX glue.
    x_emb = params["embedding"][inp]                    # [N, E]
    h0 = hidden[0]                                      # [N, H]
    c0 = cell[0]                                        # [N, H]

    N, E = x_emb.shape
    H = h0.shape[-1]
    V = params["w_out"].shape[-1]

    tile_v = min(tile_v, V)
    tile_n = N                                          # batch tile (demo: all)
    assert V % tile_v == 0 and tile_v % 128 == 0
    grid = (N // tile_n, V // tile_v)                   # (batch, vocab) tiles

    grid_spec = pltpu.PrefetchScalarGridSpec(
        num_scalar_prefetch=0,
        grid=grid,
        in_specs=[
            pl.BlockSpec((tile_n, E), lambda i, j: (i, 0)),        # x_emb
            pl.BlockSpec((tile_n, H), lambda i, j: (i, 0)),        # h0
            pl.BlockSpec((tile_n, H), lambda i, j: (i, 0)),        # c0
            pl.BlockSpec((E + H, 4 * H), lambda i, j: (0, 0)),     # w_gates
            pl.BlockSpec((1, 4 * H), lambda i, j: (0, 0)),         # b_gates
            pl.BlockSpec((H, tile_v), lambda i, j: (0, j)),        # w_out tile
            pl.BlockSpec((1, tile_v), lambda i, j: (0, j)),        # b_out tile
        ],
        out_specs=(
            # logp slab is VMEM-resident across the V axis (revisit/normalize)
            pl.BlockSpec((tile_n, V), lambda i, j: (i, 0)),
            pl.BlockSpec((tile_n, H), lambda i, j: (i, 0)),
            pl.BlockSpec((tile_n, H), lambda i, j: (i, 0)),
        ),
        scratch_shapes=[
            pltpu.VMEM((tile_n, H), jnp.float32),   # h_new
            pltpu.VMEM((tile_n, 1), jnp.float32),   # running max
            pltpu.VMEM((tile_n, 1), jnp.float32),   # running sum-exp
        ],
    )

    logp, h_new, c_new = pl.pallas_call(
        _decoder_step_kernel,
        out_shape=(jax.ShapeDtypeStruct((N, V), jnp.float32),
                   jax.ShapeDtypeStruct((N, H), jnp.float32),
                   jax.ShapeDtypeStruct((N, H), jnp.float32)),
        grid_spec=grid_spec,
        compiler_params=pltpu.CompilerParams(
            dimension_semantics=("parallel", "arbitrary"),
            vmem_limit_bytes=32 * 1024 * 1024),
    )(x_emb, h0, c0,
      params["w_gates"], params["b_gates"],
      params["w_out"], params["b_out"])

    return logp, h_new[None], c_new[None]


def _reference_forward(inp, hidden, cell, params):
    """Pure-JAX reference with the same dtypes/casts as the kernel."""
    x = jnp.tanh(params["embedding"][inp])
    h, c = hidden[0], cell[0]
    H = h.shape[-1]
    xh = jnp.concatenate([x, h], axis=-1).astype(jnp.bfloat16)
    gates = (jnp.dot(xh, params["w_gates"], preferred_element_type=jnp.float32)
             + params["b_gates"])
    i_g = jax.nn.sigmoid(gates[:, 0 * H:1 * H])
    f_g = jax.nn.sigmoid(gates[:, 1 * H:2 * H])
    g_g = jnp.tanh(gates[:, 2 * H:3 * H])
    o_g = jax.nn.sigmoid(gates[:, 3 * H:4 * H])
    c_new = f_g * c + i_g * g_g
    h_new = o_g * jnp.tanh(c_new)
    logits = (jnp.dot(h_new.astype(jnp.bfloat16), params["w_out"],
                      preferred_element_type=jnp.float32) + params["b_out"])
    return jax.nn.log_softmax(logits, axis=-1), h_new[None], c_new[None]


if __name__ == "__main__":
    # Small but lane-dense shapes (all feature dims multiples of 128).
    N = 8      # batch
    E = 128    # embedding_size
    H = 128    # hidden_size
    V = 512    # output_size (target vocab - 1), tiled over TILE_V=256

    key = jax.random.PRNGKey(0)
    k_par, k_inp, k_h, k_c = jax.random.split(key, 4)

    params = init_params(k_par, E, H, V)
    inp = jax.random.randint(k_inp, (N,), 0, V, dtype=jnp.int32)
    hidden = jax.random.normal(k_h, (1, N, H), jnp.float32)
    cell = jax.random.normal(k_c, (1, N, H), jnp.float32)

    logp, h_final, c_final = jax.jit(decoder_rnn_forward)(inp, hidden, cell, params)
    jax.block_until_ready((logp, h_final, c_final))

    assert logp.shape == (N, V)
    assert h_final.shape == (1, N, H)
    assert c_final.shape == (1, N, H)

    ref_logp, ref_h, ref_c = _reference_forward(inp, hidden, cell, params)
    np.testing.assert_allclose(np.asarray(logp), np.asarray(ref_logp),
                               rtol=2e-2, atol=2e-2)
    np.testing.assert_allclose(np.asarray(h_final), np.asarray(ref_h),
                               rtol=2e-2, atol=2e-2)
    np.testing.assert_allclose(np.asarray(c_final), np.asarray(ref_c),
                               rtol=2e-2, atol=2e-2)

    # TODO(synk): for autoregressive decoding, move the time loop inside one
    # pallas_call and alias hidden/cell via input_output_aliases so the fused
    # LSTM weights stay VMEM-resident across steps.
    print("KERNEL_OK")
</pallas_src>

<mosaic_0001>
module attributes {stable_mosaic.version = 11 : i64} {
  func.func @_decoder_step_kernel(%arg0: i32, %arg1: i32, %arg2: memref<8x128xf32, #tpu.memory_space<vmem>>, %arg3: memref<8x128xf32, #tpu.memory_space<vmem>>, %arg4: memref<8x128xf32, #tpu.memory_space<vmem>>, %arg5: memref<256x512xbf16, #tpu.memory_space<vmem>>, %arg6: memref<1x512xf32, #tpu.memory_space<vmem>>, %arg7: memref<128x256xbf16, #tpu.memory_space<vmem>>, %arg8: memref<1x256xf32, #tpu.memory_space<vmem>>, %arg9: memref<8x512xf32, #tpu.memory_space<vmem>>, %arg10: memref<8x128xf32, #tpu.memory_space<vmem>>, %arg11: memref<8x128xf32, #tpu.memory_space<vmem>>, %arg12: memref<8x128xf32, #tpu.memory_space<vmem>>, %arg13: memref<8x1xf32, #tpu.memory_space<vmem>>, %arg14: memref<8x1xf32, #tpu.memory_space<vmem>>) attributes {dimension_semantics = [#tpu.dimension_semantics<parallel>, #tpu.dimension_semantics<arbitrary>], iteration_bounds = array<i64: 1, 2>, scalar_prefetch = 0 : i64, scratch_operands = 3 : i64, tpu.core_type = #tpu.core_type<tc>, window_params = [{transform_indices = @transform_0, window_bounds = array<i64: 8, 128>}, {transform_indices = @transform_1, window_bounds = array<i64: 8, 128>}, {transform_indices = @transform_2, window_bounds = array<i64: 8, 128>}, {pipeline_mode = #tpu.pipeline_mode<synchronous>, transform_indices = @transform_3, window_bounds = array<i64: 256, 512>}, {pipeline_mode = #tpu.pipeline_mode<synchronous>, transform_indices = @transform_4, window_bounds = array<i64: 1, 512>}, {transform_indices = @transform_5, window_bounds = array<i64: 128, 256>}, {transform_indices = @transform_6, window_bounds = array<i64: 1, 256>}, {transform_indices = @transform_7, window_bounds = array<i64: 8, 512>}, {transform_indices = @transform_8, window_bounds = array<i64: 8, 128>}, {transform_indices = @transform_9, window_bounds = array<i64: 8, 128>}]} {
    %c0_i32 = arith.constant 0 : i32
    %0 = arith.cmpi eq, %arg1, %c0_i32 : i32
    %1 = arith.extui %0 : i1 to i32
    %c0_i32_0 = arith.constant 0 : i32
    %2 = arith.cmpi ne, %1, %c0_i32_0 : i32
    scf.if %2 {
      %c0_18 = arith.constant 0 : index
      %c0_19 = arith.constant 0 : index
      %33 = vector.load %arg2[%c0_18, %c0_19] : memref<8x128xf32, #tpu.memory_space<vmem>>, vector<8x128xf32>
      %34 = math.tanh %33 : vector<8x128xf32>
      %c0_20 = arith.constant 0 : index
      %c0_21 = arith.constant 0 : index
      %35 = vector.load %arg3[%c0_20, %c0_21] : memref<8x128xf32, #tpu.memory_space<vmem>>, vector<8x128xf32>
      %c0_22 = arith.constant 0 : index
      %c0_23 = arith.constant 0 : index
      %36 = vector.load %arg4[%c0_22, %c0_23] : memref<8x128xf32, #tpu.memory_space<vmem>>, vector<8x128xf32>
      %37 = tpu.concatenate %34, %35 in 1 : vector<8x128xf32>, vector<8x128xf32> -> vector<8x256xf32>
      %38 = arith.truncf %37 : vector<8x256xf32> to vector<8x256xbf16>
      %c0_24 = arith.constant 0 : index
      %c0_25 = arith.constant 0 : index
      %39 = vector.load %arg5[%c0_24, %c0_25] : memref<256x512xbf16, #tpu.memory_space<vmem>>, vector<256x512xbf16>
      %cst_26 = arith.constant dense<0.000000e+00> : vector<8x512xf32>
      %40 = tpu.matmul %38, %39, %cst_26 {dimension_numbers = #tpu.dot_dimension_numbers<[1], [0], [0], [1], [0, 0, 1, 1], [], []>} : vector<8x256xbf16>, vector<256x512xbf16>, vector<8x512xf32> -> vector<8x512xf32>
      %c0_27 = arith.constant 0 : index
      %c0_28 = arith.constant 0 : index
      %41 = vector.load %arg6[%c0_27, %c0_28] : memref<1x512xf32, #tpu.memory_space<vmem>>, vector<1x512xf32>
      %42 = vector.broadcast %41 : vector<1x512xf32> to vector<8x512xf32>
      %43 = arith.addf %40, %42 : vector<8x512xf32>
      %44 = vector.extract_strided_slice %43 {offsets = [0, 0], sizes = [8, 128], strides = [1, 1]} : vector<8x512xf32> to vector<8x128xf32>
      %45 = arith.negf %44 : vector<8x128xf32>
      %46 = math.exp %45 : vector<8x128xf32>
      %cst_29 = arith.constant 1.000000e+00 : f32
      %47 = vector.broadcast %cst_29 : f32 to vector<8x128xf32>
      %48 = arith.addf %47, %46 : vector<8x128xf32>
      %49 = arith.divf %47, %48 : vector<8x128xf32>
      %50 = vector.extract_strided_slice %43 {offsets = [0, 128], sizes = [8, 128], strides = [1, 1]} : vector<8x512xf32> to vector<8x128xf32>
      %51 = arith.negf %50 : vector<8x128xf32>
      %52 = math.exp %51 : vector<8x128xf32>
      %cst_30 = arith.constant 1.000000e+00 : f32
      %53 = vector.broadcast %cst_30 : f32 to vector<8x128xf32>
      %54 = arith.addf %53, %52 : vector<8x128xf32>
      %55 = arith.divf %53, %54 : vector<8x128xf32>
      %56 = vector.extract_strided_slice %43 {offsets = [0, 256], sizes = [8, 128], strides = [1, 1]} : vector<8x512xf32> to vector<8x128xf32>
      %57 = math.tanh %56 : vector<8x128xf32>
      %58 = vector.extract_strided_slice %43 {offsets = [0, 384], sizes = [8, 128], strides = [1, 1]} : vector<8x512xf32> to vector<8x128xf32>
      %59 = arith.negf %58 : vector<8x128xf32>
      %60 = math.exp %59 : vector<8x128xf32>
      %cst_31 = arith.constant 1.000000e+00 : f32
      %61 = vector.broadcast %cst_31 : f32 to vector<8x128xf32>
      %62 = arith.addf %61, %60 : vector<8x128xf32>
      %63 = arith.divf %61, %62 : vector<8x128xf32>
      %64 = arith.mulf %55, %36 : vector<8x128xf32>
      %65 = arith.mulf %49, %57 : vector<8x128xf32>
      %66 = arith.addf %64, %65 : vector<8x128xf32>
      %67 = math.tanh %66 : vector<8x128xf32>
      %68 = arith.mulf %63, %67 : vector<8x128xf32>
      %c0_32 = arith.constant 0 : index
      %c0_33 = arith.constant 0 : index
      %69 = vector.load %arg12[%c0_32, %c0_33] : memref<8x128xf32, #tpu.memory_space<vmem>>, vector<8x128xf32>
      tpu.vector_store %arg12[%c0_32, %c0_33], %68 {strides = array<i32>} : memref<8x128xf32, #tpu.memory_space<vmem>>, vector<8x128xf32>,
      %c0_34 = arith.constant 0 : index
      %c0_35 = arith.constant 0 : index
      %70 = vector.load %arg10[%c0_34, %c0_35] : memref<8x128xf32, #tpu.memory_space<vmem>>, vector<8x128xf32>
      tpu.vector_store %arg10[%c0_34, %c0_35], %68 {strides = array<i32>} : memref<8x128xf32, #tpu.memory_space<vmem>>, vector<8x128xf32>,
      %c0_36 = arith.constant 0 : index
      %c0_37 = arith.constant 0 : index
      %71 = vector.load %arg11[%c0_36, %c0_37] : memref<8x128xf32, #tpu.memory_space<vmem>>, vector<8x128xf32>
      tpu.vector_store %arg11[%c0_36, %c0_37], %66 {strides = array<i32>} : memref<8x128xf32, #tpu.memory_space<vmem>>, vector<8x128xf32>,
      %cst_38 = arith.constant 0xFF800000 : f32
      %72 = vector.broadcast %cst_38 : f32 to vector<8x1xf32>
      %c0_39 = arith.constant 0 : index
      %c0_40 = arith.constant 0 : index
      %73 = vector.load %arg13[%c0_39, %c0_40] : memref<8x1xf32, #tpu.memory_space<vmem>>, vector<8x1xf32>
      tpu.vector_store %arg13[%c0_39, %c0_40], %72 {strides = array<i32>} : memref<8x1xf32, #tpu.memory_space<vmem>>, vector<8x1xf32>,
      %cst_41 = arith.constant 0.000000e+00 : f32
      %74 = vector.broadcast %cst_41 : f32 to vector<8x1xf32>
      %c0_42 = arith.constant 0 : index
      %c0_43 = arith.constant 0 : index
      %75 = vector.load %arg14[%c0_42, %c0_43] : memref<8x1xf32, #tpu.memory_space<vmem>>, vector<8x1xf32>
      tpu.vector_store %arg14[%c0_42, %c0_43], %74 {strides = array<i32>} : memref<8x1xf32, #tpu.memory_space<vmem>>, vector<8x1xf32>,
    } else {
    }
    %c0 = arith.constant 0 : index
    %c0_1 = arith.constant 0 : index
    %3 = vector.load %arg12[%c0, %c0_1] : memref<8x128xf32, #tpu.memory_space<vmem>>, vector<8x128xf32>
    %4 = arith.truncf %3 : vector<8x128xf32> to vector<8x128xbf16>
    %c0_2 = arith.constant 0 : index
    %c0_3 = arith.constant 0 : index
    %5 = vector.load %arg7[%c0_2, %c0_3] : memref<128x256xbf16, #tpu.memory_space<vmem>>, vector<128x256xbf16>
    %cst = arith.constant dense<0.000000e+00> : vector<8x256xf32>
    %6 = tpu.matmul %4, %5, %cst {dimension_numbers = #tpu.dot_dimension_numbers<[1], [0], [0], [1], [0, 0, 1, 1], [], []>} : vector<8x128xbf16>, vector<128x256xbf16>, vector<8x256xf32> -> vector<8x256xf32>
    %c0_4 = arith.constant 0 : index
    %c0_5 = arith.constant 0 : index
    %7 = vector.load %arg8[%c0_4, %c0_5] : memref<1x256xf32, #tpu.memory_space<vmem>>, vector<1x256xf32>
    %8 = vector.broadcast %7 : vector<1x256xf32> to vector<8x256xf32>
    %9 = arith.addf %6, %8 : vector<8x256xf32>
    %c0_6 = arith.constant 0 : index
    %c0_7 = arith.constant 0 : index
    %10 = vector.load %arg13[%c0_6, %c0_7] : memref<8x1xf32, #tpu.memory_space<vmem>>, vector<8x1xf32>
    %cst_8 = arith.constant dense<0xFF800000> : vector<8xf32>
    %11 = vector.multi_reduction <maximumf>, %9, %cst_8 [1] : vector<8x256xf32> to vector<8xf32>
    %12 = vector.shape_cast %11 : vector<8xf32> to vector<8x1xf32>
    %13 = arith.maximumf %10, %12 : vector<8x1xf32>
    %c0_9 = arith.constant 0 : index
    %c0_10 = arith.constant 0 : index
    %14 = vector.load %arg14[%c0_9, %c0_10] : memref<8x1xf32, #tpu.memory_space<vmem>>, vector<8x1xf32>
    %15 = arith.subf %10, %13 : vector<8x1xf32>
    %16 = math.exp %15 : vector<8x1xf32>
    %17 = arith.mulf %14, %16 : vector<8x1xf32>
    %18 = vector.broadcast %13 : vector<8x1xf32> to vector<8x256xf32>
    %19 = arith.subf %9, %18 : vector<8x256xf32>
    %20 = math.exp %19 : vector<8x256xf32>
    %cst_11 = arith.constant dense<0.000000e+00> : vector<8xf32>
    %21 = vector.multi_reduction <add>, %20, %cst_11 [1] : vector<8x256xf32> to vector<8xf32>
    %22 = vector.shape_cast %21 : vector<8xf32> to vector<8x1xf32>
    %23 = arith.addf %17, %22 : vector<8x1xf32>
    %c0_12 = arith.constant 0 : index
    %c0_13 = arith.constant 0 : index
    %24 = vector.load %arg14[%c0_12, %c0_13] : memref<8x1xf32, #tpu.memory_space<vmem>>, vector<8x1xf32>
    tpu.vector_store %arg14[%c0_12, %c0_13], %23 {strides = array<i32>} : memref<8x1xf32, #tpu.memory_space<vmem>>, vector<8x1xf32>,
    %c0_14 = arith.constant 0 : index
    %c0_15 = arith.constant 0 : index
    %25 = vector.load %arg13[%c0_14, %c0_15] : memref<8x1xf32, #tpu.memory_space<vmem>>, vector<8x1xf32>
    tpu.vector_store %arg13[%c0_14, %c0_15], %13 {strides = array<i32>} : memref<8x1xf32, #tpu.memory_space<vmem>>, vector<8x1xf32>,
    %c256_i32 = arith.constant 256 : i32
    %26 = arith.muli %arg1, %c256_i32 : i32
    %27 = tpu.assume_multiple %26, 128 : i32
    %c0_16 = arith.constant 0 : index
    %28 = arith.index_cast %27 : i32 to index
    %29 = vector.load %arg9[%c0_16, %28] : memref<8x512xf32, #tpu.memory_space<vmem>>, vector<8x256xf32>
    tpu.vector_store %arg9[%c0_16, %28], %9 {strides = array<i32>} : memref<8x512xf32, #tpu.memory_space<vmem>>, vector<8x256xf32>,
    %c1_i32 = arith.constant 1 : i32
    %30 = arith.cmpi eq, %arg1, %c1_i32 : i32
    %31 = arith.extui %30 : i1 to i32
    %c0_i32_17 = arith.constant 0 : i32
    %32 = arith.cmpi ne, %31, %c0_i32_17 : i32
    scf.if %32 {
      %c0_18 = arith.constant 0 : index
      %c0_19 = arith.constant 0 : index
      %33 = vector.load %arg13[%c0_18, %c0_19] : memref<8x1xf32, #tpu.memory_space<vmem>>, vector<8x1xf32>
      %c0_20 = arith.constant 0 : index
      %c0_21 = arith.constant 0 : index
      %34 = vector.load %arg14[%c0_20, %c0_21] : memref<8x1xf32, #tpu.memory_space<vmem>>, vector<8x1xf32>
      %35 = math.log %34 : vector<8x1xf32>
      %36 = arith.addf %33, %35 : vector<8x1xf32>
      %c0_22 = arith.constant 0 : index
      %c0_23 = arith.constant 0 : index
      %37 = vector.load %arg9[%c0_22, %c0_23] : memref<8x512xf32, #tpu.memory_space<vmem>>, vector<8x512xf32>
      %38 = vector.broadcast %36 : vector<8x1xf32> to vector<8x512xf32>
      %39 = arith.subf %37, %38 : vector<8x512xf32>
      %c0_24 = arith.constant 0 : index
      %c0_25 = arith.constant 0 : index
      %40 = vector.load %arg9[%c0_24, %c0_25] : memref<8x512xf32, #tpu.memory_space<vmem>>, vector<8x512xf32>
      tpu.vector_store %arg9[%c0_24, %c0_25], %39 {strides = array<i32>} : memref<8x512xf32, #tpu.memory_space<vmem>>, vector<8x512xf32>,
    } else {
    }
    return
  }
  func.func @transform_0(%arg0: i32, %arg1: i32) -> (i32, i32) {
    %c0_i32 = arith.constant 0 : i32
    %c0_i32_0 = arith.constant 0 : i32
    return %arg0, %c0_i32 : i32, i32
  }
  func.func @transform_1(%arg0: i32, %arg1: i32) -> (i32, i32) {
    %c0_i32 = arith.constant 0 : i32
    %c0_i32_0 = arith.constant 0 : i32
    return %arg0, %c0_i32 : i32, i32
  }
  func.func @transform_2(%arg0: i32, %arg1: i32) -> (i32, i32) {
    %c0_i32 = arith.constant 0 : i32
    %c0_i32_0 = arith.constant 0 : i32
    return %arg0, %c0_i32 : i32, i32
  }
  func.func @transform_3(%arg0: i32, %arg1: i32) -> (i32, i32) {
    %c0_i32 = arith.constant 0 : i32
    %c0_i32_0 = arith.constant 0 : i32
    %c0_i32_1 = arith.constant 0 : i32
    return %c0_i32, %c0_i32_0 : i32, i32
  }
  func.func @transform_4(%arg0: i32, %arg1: i32) -> (i32, i32) {
    %c0_i32 = arith.constant 0 : i32
    %c0_i32_0 = arith.constant 0 : i32
    %c0_i32_1 = arith.constant 0 : i32
    return %c0_i32, %c0_i32_0 : i32, i32
  }
  func.func @transform_5(%arg0: i32, %arg1: i32) -> (i32, i32) {
    %c0_i32 = arith.constant 0 : i32
    %c0_i32_0 = arith.constant 0 : i32
    return %c0_i32, %arg1 : i32, i32
  }
  func.func @transform_6(%arg0: i32, %arg1: i32) -> (i32, i32) {
    %c0_i32 = arith.constant 0 : i32
    %c0_i32_0 = arith.constant 0 : i32
    return %c0_i32, %arg1 : i32, i32
  }
  func.func @transform_7(%arg0: i32, %arg1: i32) -> (i32, i32) {
    %c0_i32 = arith.constant 0 : i32
    %c0_i32_0 = arith.constant 0 : i32
    return %arg0, %c0_i32 : i32, i32
  }
  func.func @transform_8(%arg0: i32, %arg1: i32) -> (i32, i32) {
    %c0_i32 = arith.constant 0 : i32
    %c0_i32_0 = arith.constant 0 : i32
    return %arg0, %c0_i32 : i32, i32
  }
  func.func @transform_9(%arg0: i32, %arg1: i32) -> (i32, i32) {
    %c0_i32 = arith.constant 0 : i32
    %c0_i32_0 = arith.constant 0 : i32
    return %arg0, %c0_i32 : i32, i32
  }
}

</mosaic_0001>

<bundles_post_ra>
// kernel: decoder_rnn_forward.1
= control target key start
LH: loop header
LB: loop body
LE: loop exit
PB: predicated region body
PF: predicated region fallthrough
CT: control target
= control target key end

     0   :  { %s2270_s0 = inlined_call_operand.vmem [shape: f32[8,128], index: 0, kind: input, shape index: {}]   ;;  %s2271_s1 = inlined_call_operand.vmem [shape: f32[8,128], index: 1, kind: input, shape index: {}]   ;;  %s2272_s2 = inlined_call_operand.vmem [shape: f32[8,128], index: 2, kind: input, shape index: {}]   ;;  %s2273_s3 = inlined_call_operand.hbm [shape: bf16[256,512], index: 3, kind: input, shape index: {}]   ;;  %s2274_s4 = inlined_call_operand.vmem [shape: f32[1,512], index: 4, kind: input, shape index: {}]   ;;  %s2275_s5 = inlined_call_operand.hbm [shape: bf16[128,512], index: 5, kind: input, shape index: {}]   ;;  %s2276_s6 = inlined_call_operand.vmem [shape: f32[1,512], index: 6, kind: input, shape index: {}]   ;;  %s2277_s7 = inlined_call_operand.hbm [shape: f32[8,512], index: 7, kind: output, shape index: {0}]   ;;  %s2278_s8 = inlined_call_operand.hbm [shape: f32[8,128], index: 8, kind: output, shape index: {1}]   ;;  %s2279_s9 = inlined_call_operand.hbm [shape: f32[8,128], index: 9, kind: output, shape index: {2}]  }
   0x1   :  { %2288 = sst [smem:[#allocation18_spill]] %s2273_s3 }
   0x2   :  { %2289 = sst [smem:[#allocation19_spill]] %s2279_s9 }
   0x3   :  { %15 = vsyncpa [#allocation6], 0 }
   0x4   :  { %16 = vsyncpa [#allocation9], 0 }
   0x5   :  { %18 = vsyncpa [#allocation9 + $0x1], 0 }
   0x6   :  { %19 = vsyncpa [#allocation7], 0 }
   0x7   :  { %20 = vsyncpa [#allocation12], 0  ;;  %s1995_s30 = smov 0   ;;  %s1997_s10 = smov 0  }
   0x8   :  { %s1999_s11 = smov 0   ;;  %s2001_s12 = smov 0  }
   0x9   :  { %s2003_s13 = smov 0   ;;  %s2005_s14 = smov 0  }
   0xa LB: > { %s2285_s15 = sadd.s32 4294967295, %s1930_s14   ;;  %p172_p0 = scmp.ne.s32.totalorder %s1918_s11, %s1914_s10  ;;  %s1930_s14 = sphi %s2005_s14, %s26_s14   ;;  %s1926_s13 = sphi %s2003_s13, %s2309_s13   ;;  %s1922_s12 = sphi %s2001_s12, %s2308_s12   ;;  %s1918_s11 = sphi %s1999_s11, %s2307_s11   ;;  %s1914_s10 = sphi %s1997_s10, %s2306_s10   ;;  %s1910_s30 = sphi %s1995_s30, %s2305_s30  }
   0xb   : > { %p173_p1 = scmp.eq.s32.totalorder %s1930_s14, 0  ;;  %p178_p2 = scmp.ne.s32.totalorder %s1914_s10, %s1910_s30 }
   0xc   : > { %p2030_p3 = scmp.eq.s32.totalorder %s2285_s15, 0  ;;  %p1380_p4 = scmp.ge.s32.totalorder %s1930_s14, 1 }
   0xd   : > { %p174_p5 = por %p173_p1, %p172_p0  ;;  %p293_p6 = scmp.lt.s32.totalorder %s1930_s14, 3 }
   0xe   : > { %s2290_s16 = scalar_select %p2030_p3, 1, 0 }
   0xf   : > { %p2038_p7 = por %p2030_p3, %p178_p2  ;;  %p2042_p8 = pnand %p1380_p4, %p293_p6 }
  0x10   : > { %s1932_s19 = smov [#allocation5]   ;;  %p1516_p11 = scmp.lt.s32.totalorder %s1930_s14, 2 }
  0x11   : > { %s2291_s17 = scalar_select %p2038_p7, 1, 0 }
  0x12   : > { %s2292_s18 = scalar_select %p2042_p8, 1, 0 }
  0x13   : > { %s326_s20 = sshll.u32 %s1932_s19, 4  ;;  %p1507_p9 = pneg %p2042_p8  ;;  %s327_s20 = int_to_ptr.vmem [resolvable:$true] %s326_s20 }
  0x14   : > { %p2056_p12 = pnand %p1516_p11, %p174_p5  ;;  %s2295_s3 = sld [smem:[#allocation18_spill]] }
  0x15   : > { %p2050_p10 = pnand %p1507_p9, %p2030_p3 }
  0x16   : > { %s2294_s23 = scalar_select %p2056_p12, 1, 0 }
  0x17   : > { %p1734_p0 = pneg %p2050_p10 }
  0x1a   : > { %s1732_s26 = scalar_lea.hbm %s2295_s3, 8192 }
  0x1b   : > { %p1733_p13 = scmp.ne.s32.totalorder %s2295_s3, %s1732_s26  ;;  %p1739_p4 = scmp.lt.u32.totalorder %s1732_s26, %s2295_s3 }
  0x1d   : > { %p1735_p1 = pnand %p1734_p0, %p1733_p13 }
  0x1f   : > { %p1736_p2 = pneg %p1735_p1 }
  0x21   : > { %p1741_p5 = pnand %p1739_p4, %p1736_p2 }
  0x23   : > { %1744 = shalt.err (!%p1741_p5)
}
  0x24   : > { %s1745_s19 = scalar_lea.vmem %s327_s20, 8192  ;;  %p1753_p7 = scmp.lt.s32.totalorder %s327_s20, %s327_s20 }
  0x25   : > { %p1746_p6 = scmp.ne.s32.totalorder %s327_s20, %s1745_s19  ;;  %p1754_p3 = scmp.lt.s32.totalorder %s1745_s19, %s1745_s19 }
  0x27   : > { %p1748_p9 = pnand %p1746_p6, %p1734_p0  ;;  %p1755_p8 = por %p1754_p3, %p1753_p7 }
  0x29   : > { %p1749_p11 = pneg %p1748_p9 }
  0x2b   : > { %p1756_p12 = pnand %p1755_p8, %p1749_p11 }
  0x2d   : > { %1759 = shalt.err (!%p1756_p12)
}
  0x2e   : > { %s2286_s24 = smov 256   ;;  %s1934_s25 = smov 16  }
  0x2f   : > { %1510 = dma.hbm_to_vmem [thread:$0]  (!%p2050_p10), %s2295_s3, 8192, %s327_s20, [#allocation6], %s2286_s24, %s2286_s24, %s1934_s25  }
  0x30   : > { %s35_s28 = sadd.s32 1, %s1926_s13  ;;  %s343_s29 = sand.u32 1, %s1918_s11  }
  0x31   : > { %p36_p3 = scmp.ge.s32.totalorder %s35_s28, 2  ;;  %s1386_s30 = sshll.u32 %s343_s29, 7 }
  0x32   : > { %s1488_s19 = sshll.u32 %s1926_s13, 7  ;;  %s347_s20 = scalar_lea.vmem [#allocation8], %s1386_s30 }
  0x33   : > { %s2311_s28 = smov (%p36_p3, %s35_s28), 0  ;;  %s2086_s21 = scalar_lea.hbm %s2275_s5, %s1488_s19 }
  0x34   : > { %s162_s26 = ssub.s32 %s1926_s13, %s2311_s28  ;;  %s354_s25 = sshll.u32 %s347_s20, 4  ;;  %s2090_s25 = int_to_ptr.vmem [resolvable:$true] %s354_s25 }
  0x35   : > { %p163_p7 = scmp.eq.s32.totalorder %s162_s26, 0  ;;  %s2296_s27 = sadd.s32 1, %s1918_s11 }
  0x36   : > { %s2097_s3 = scalar_lea.sflag [#allocation9], %s343_s29  ;;  %s1760_s9 = scalar_lea.hbm %s2086_s21, 2048 }
  0x37   : > { %s2095_s24 = scalar_select %p163_p7, %s1918_s11, %s2296_s27  }
  0x38   : > { %p1761_p8 = scmp.ne.s32.totalorder %s2086_s21, %s1760_s9  ;;  %p2297_p10 = scmp.ne.s32.totalorder %s2294_s23, 0 }
  0x39   : > { %s1765_s30 = scalar_lea.hbm %s2275_s5, 4096  ;;  %p1766_p1 = scmp.lt.u32.totalorder %s2086_s21, %s2275_s5 }
  0x3a   : > { %p1762_p12 = pneg %p2297_p10  ;;  %p1767_p2 = scmp.lt.u32.totalorder %s1765_s30, %s1760_s9 }
  0x3b   : > { %p1769_p5 = scmp.lt.u32.totalorder %s1760_s9, %s2086_s21 }
  0x3c   : > { %p1763_p13 = pnand %p1762_p12, %p1761_p8  ;;  %p1768_p4 = por %p1767_p2, %p1766_p1 }
  0x3e   : > { %p1764_p0 = pneg %p1763_p13  ;;  %p1770_p6 = por %p1769_p5, %p1768_p4 }
  0x40   : > { %p1771_p9 = pnand %p1770_p6, %p1764_p0 }
  0x42   : > { %1774 = shalt.err (!%p1771_p9)
}
  0x43   : > { %s1775_s29 = scalar_lea.vmem %s2090_s25, 2048  ;;  %s1935_s20 = smov [#allocation8]  }
  0x44   : > { %p1776_p11 = scmp.ne.s32.totalorder %s2090_s25, %s1775_s29  ;;  %s1780_s27 = sshll.u32 %s1935_s20, 4  ;;  %s1781_s27 = int_to_ptr.vmem [resolvable:$false] %s1780_s27 }
  0x45   : > { %s1782_s15 = scalar_lea.vmem %s1781_s27, 4096  ;;  %p1783_p8 = scmp.lt.s32.totalorder %s2090_s25, %s1781_s27 }
  0x46   : > { %p1778_p3 = pnand %p1776_p11, %p1762_p12  ;;  %p1784_p13 = scmp.lt.s32.totalorder %s1782_s15, %s1775_s29 }
  0x48   : > { %p1779_p7 = pneg %p1778_p3  ;;  %p1785_p1 = por %p1784_p13, %p1783_p8 }
  0x4a   : > { %p1786_p2 = pnand %p1785_p1, %p1779_p7 }
  0x4c   : > { %1789 = shalt.err (!%p1786_p2)
}
  0x4d   : > { %s1936_s9 = smov 128   ;;  %s1937_s22 = smov 8  }
  0x4e   : > { %s2298_s30 = smov 256   ;;  %p2299_p12 = scmp.ne.s32.totalorder %s2292_s18, 0 }
  0x4f   : > { %1514 = dma.hbm_to_vmem [thread:$0]  (!%p2297_p10), %s2086_s21, 2048, %s2090_s25, %s2097_s3, %s2298_s30, %s1936_s9, %s1937_s22  }
  0x50   : > { %374 = sbr.rel (%p2299_p12) target bundleno = 1334 (0x536), region = 48  ;;  %p2300_p0 = scmp.ne.s32.totalorder (!%p2299_p12), %s2290_s16, 0 }
  0x57   : > { %1893 = dma.done.wait (%p2300_p0), [#allocation6], 8192  }
  0x58   : > { %1895 = vsyncadd (%p2300_p0), [#allocation6], 4294959104  ;;  %s380_s19 = sand.u32 1, %s1914_s10   ;;  %p2301_p4 = scmp.ne.s32.totalorder %s2291_s17, 0 }
  0x59   : > { %s1391_s26 = sshll.u32 %s380_s19, 7  ;;  %s381_s29 = scalar_lea.sflag [#allocation9], %s380_s19 }
  0x5a   : > { %s2133_s20 = scalar_lea.vmem [#allocation8], %s1391_s26 }
  0x5b   : > { %1897 = dma.done.wait (%p2301_p4), %s381_s29, 2048  }
  0x5c   : > { %1899 = vsyncadd (%p2301_p4), %s381_s29, 4294965248  ;;  %s1392_s3 = sshll.u32 %s1922_s12, 1  ;;  %p1393_p5 = scmp.ne.s32.totalorder %s1922_s12, 0 }
  0x5d   : > { %p444_p10 = scmp.lt.s32.totalorder %s1392_s3, 3  ;;  %v1584_v0 = vld [vmem:[#allocation5 + $0x4] ss:$16 sps:$4 sm:$0xff] (!%p1393_p5)   ;;  %v1586_v1 = vld [vmem:[#allocation5] ss:$16 sps:$4 sm:$0xff] (!%p1393_p5)   ;;  %v455_v40 = vld [vmem:[%s2271_s1] sm:$0xff] (!%p1393_p5) }
  0x5e   : > { %452 = sbr.rel (%p1393_p5) target bundleno = 417 (0x1a1), region = 60  ;;  %865 = vmatprep.subr.bf16.mxu0 (!%p1393_p5), %v1584_v0  ;;  %v1587_v2 = vld [vmem:[#allocation5 + $0x24] ss:$16 sps:$4 sm:$0xff] (!%p1393_p5)   ;;  %v1589_v3 = vld [vmem:[#allocation5 + $0x20] ss:$16 sps:$4 sm:$0xff] (!%p1393_p5)   ;;  %v458_v42 = vpack.c.bf16 (!%p1393_p5), %v455_v40, %v455_v40  ;;  %v453_v50 = vld [vmem:[%s2270_s0] sm:$0xff] (!%p1393_p5) }
  0x5f   : > { %s2313_s3 = smov (!%p444_p10, %s1392_s3), 3  ;;  %866 = vmatpush1.bf16.msra.mxu0 (!%p1393_p5), %v1586_v1  ;;  %v1590_v4 = vld [vmem:[#allocation5 + $0x44] ss:$16 sps:$4 sm:$0xff] (!%p1393_p5)   ;;  %v1595_v5 = vld [vmem:[#allocation5 + $0xc] ss:$16 sps:$4 sm:$0xff] (!%p1393_p5)   ;;  %1680 = vtanh.f32 (!%p1393_p5), %v453_v50  ;;  %vm974_vm0 = vcmask (!%p1393_p5), 7168  }
  0x60   : > { %s446_s23 = scalar_lea.vmem %s2276_s6, %s2313_s3  ;;  %867 = vmatprep.subr.bf16.mxu0 (!%p1393_p5), %v1587_v2  ;;  %v1598_v6 = vld [vmem:[#allocation5 + $0x8] ss:$16 sps:$4 sm:$0xff] (!%p1393_p5)   ;;  %v1592_v7 = vld [vmem:[#allocation5 + $0x40] ss:$16 sps:$4 sm:$0xff] (!%p1393_p5)   ;;  %906 = vmatprep.subr.bf16.mxu1 (!%p1393_p5), %v1595_v5  ;;  %v1593_v8 = vld [vmem:[#allocation5 + $0x64] ss:$16 sps:$4 sm:$0xff] (!%p1393_p5)  }
  0x61   : > { %907 = vmatpush1.bf16.msra.mxu1 (!%p1393_p5), %v1598_v6  ;;  %v1601_v9 = vld [vmem:[#allocation5 + $0x2c] ss:$16 sps:$4 sm:$0xff] (!%p1393_p5)   ;;  %v1604_v10 = vld [vmem:[#allocation5 + $0x28] ss:$16 sps:$4 sm:$0xff] (!%p1393_p5)   ;;  %v1597_v11 = vld [vmem:[#allocation5 + $0x60] ss:$16 sps:$4 sm:$0xff] (!%p1393_p5)   ;;  %897 = vmatprep.mubr.bf16.mxu0 (!%p1393_p5), %v458_v42 }
  0x62   : > { %908 = vmatprep.subr.bf16.mxu1 (!%p1393_p5), %v1601_v9  ;;  %v1599_v12 = vld [vmem:[#allocation5 + $0x84] ss:$16 sps:$4 sm:$0xff] (!%p1393_p5)   ;;  %v1607_v13 = vld [vmem:[#allocation5 + $0x4c] ss:$16 sps:$4 sm:$0xff] (!%p1393_p5)   ;;  %v1610_v14 = vld [vmem:[#allocation5 + $0x48] ss:$16 sps:$4 sm:$0xff] (!%p1393_p5)   ;;  %938 = vmatprep.mubr.bf16.mxu1 (!%p1393_p5), %v458_v42 }
  0x63   : > { %868 = vmatpush1.bf16.msra.mxu0 (!%p1393_p5), %v1589_v3  ;;  %v1613_v15 = vld [vmem:[#allocation5 + $0x6c] ss:$16 sps:$4 sm:$0xff] (!%p1393_p5)   ;;  %v1603_v16 = vld [vmem:[#allocation5 + $0x80] ss:$16 sps:$4 sm:$0xff] (!%p1393_p5)   ;;  %v1605_v17 = vld [vmem:[#allocation5 + $0xa4] ss:$16 sps:$4 sm:$0xff] (!%p1393_p5)  }
  0x64   : > { %869 = vmatprep.subr.bf16.mxu0 (!%p1393_p5), %v1590_v4  ;;  %v1616_v18 = vld [vmem:[#allocation5 + $0x68] ss:$16 sps:$4 sm:$0xff] (!%p1393_p5)   ;;  %v1619_v19 = vld [vmem:[#allocation5 + $0x8c] ss:$16 sps:$4 sm:$0xff] (!%p1393_p5)   ;;  %v1609_v20 = vld [vmem:[#allocation5 + $0xa0] ss:$16 sps:$4 sm:$0xff] (!%p1393_p5)  }
  0x65   : > { %909 = vmatpush1.bf16.msra.mxu1 %v1604_v10  ;;  %v1611_v21 = vld [vmem:[#allocation5 + $0xc4] ss:$16 sps:$4 sm:$0xff]   ;;  %v1622_v22 = vld [vmem:[#allocation5 + $0x88] ss:$16 sps:$4 sm:$0xff]   ;;  %v1625_v23 = vld [vmem:[#allocation5 + $0xac] ss:$16 sps:$4 sm:$0xff]  }
  0x66   : > { %910 = vmatprep.subr.bf16.mxu1 %v1607_v13  ;;  %v1615_v24 = vld [vmem:[#allocation5 + $0xc0] ss:$16 sps:$4 sm:$0xff]   ;;  %v1617_v25 = vld [vmem:[#allocation5 + $0xe4] ss:$16 sps:$4 sm:$0xff]   ;;  %v1628_v26 = vld [vmem:[#allocation5 + $0xa8] ss:$16 sps:$4 sm:$0xff]  }
  0x67   : > { %870 = vmatpush1.bf16.msra.mxu0 %v1592_v7  ;;  %v1631_v27 = vld [vmem:[#allocation5 + $0xcc] ss:$16 sps:$4 sm:$0xff]   ;;  %v1621_v28 = vld [vmem:[#allocation5 + $0xe0] ss:$16 sps:$4 sm:$0xff]   ;;  %v1623_v29 = vld [vmem:[#allocation5 + $0x104] ss:$16 sps:$4 sm:$0xff]   ;;  %v525_v7 = vlaneseq }
  0x68   : > { %871 = vmatprep.subr.bf16.mxu0 %v1593_v8  ;;  %v1634_v30 = vld [vmem:[#allocation5 + $0xc8] ss:$16 sps:$4 sm:$0xff]   ;;  %v1637_v31 = vld [vmem:[#allocation5 + $0xec] ss:$16 sps:$4 sm:$0xff]   ;;  %v1627_v32 = vld [vmem:[#allocation5 + $0x100] ss:$16 sps:$4 sm:$0xff]  }
  0x69   : > { %911 = vmatpush1.bf16.msra.mxu1 %v1610_v14  ;;  %v1629_v33 = vld [vmem:[#allocation5 + $0x124] ss:$16 sps:$4 sm:$0xff]   ;;  %v1640_v34 = vld [vmem:[#allocation5 + $0xe8] ss:$16 sps:$4 sm:$0xff]   ;;  %v1643_v35 = vld [vmem:[#allocation5 + $0x10c] ss:$16 sps:$4 sm:$0xff]   ;;  %v1681_v63 = vpop.eup %1680 }
  0x6a   : > { %912 = vmatprep.subr.bf16.mxu1 %v1613_v15  ;;  %v1633_v36 = vld [vmem:[#allocation5 + $0x120] ss:$16 sps:$4 sm:$0xff]   ;;  %v1635_v37 = vld [vmem:[#allocation5 + $0x144] ss:$16 sps:$4 sm:$0xff]   ;;  %v1646_v38 = vld [vmem:[#allocation5 + $0x108] ss:$16 sps:$4 sm:$0xff]   ;;  %v457_v3 = vpack.c.bf16 %v1681_v63, %v1681_v63 }
  0x6b   : > { %872 = vmatpush1.bf16.msra.mxu0 %v1597_v11  ;;  %v1649_v39 = vld [vmem:[#allocation5 + $0x12c] ss:$16 sps:$4 sm:$0xff]   ;;  %v1639_v41 = vld [vmem:[#allocation5 + $0x140] ss:$16 sps:$4 sm:$0xff]   ;;  %v1641_v43 = vld [vmem:[#allocation5 + $0x164] ss:$16 sps:$4 sm:$0xff]  }
  0x6c   : > { %873 = vmatprep.subr.bf16.mxu0 %v1599_v12  ;;  %v1652_v44 = vld [vmem:[#allocation5 + $0x128] ss:$16 sps:$4 sm:$0xff]   ;;  %v1655_v45 = vld [vmem:[#allocation5 + $0x14c] ss:$16 sps:$4 sm:$0xff]   ;;  %v1645_v46 = vld [vmem:[#allocation5 + $0x160] ss:$16 sps:$4 sm:$0xff]  }
  0x6d   : > { %913 = vmatpush1.bf16.msra.mxu1 %v1616_v18  ;;  %v1647_v47 = vld [vmem:[#allocation5 + $0x184] ss:$16 sps:$4 sm:$0xff]   ;;  %v1658_v48 = vld [vmem:[#allocation5 + $0x148] ss:$16 sps:$4 sm:$0xff]   ;;  %v1661_v49 = vld [vmem:[#allocation5 + $0x16c] ss:$16 sps:$4 sm:$0xff]  }
  0x6e   : > { %914 = vmatprep.subr.bf16.mxu1 %v1619_v19  ;;  %v1651_v51 = vld [vmem:[#allocation5 + $0x180] ss:$16 sps:$4 sm:$0xff]   ;;  %v1653_v52 = vld [vmem:[#allocation5 + $0x1a4] ss:$16 sps:$4 sm:$0xff]   ;;  %v1664_v53 = vld [vmem:[#allocation5 + $0x168] ss:$16 sps:$4 sm:$0xff]  }
  0x6f   : > { %874 = vmatpush1.bf16.msra.mxu0 %v1603_v16  ;;  %v1667_v54 = vld [vmem:[#allocation5 + $0x18c] ss:$16 sps:$4 sm:$0xff]   ;;  %v1657_v55 = vld [vmem:[#allocation5 + $0x1a0] ss:$16 sps:$4 sm:$0xff]   ;;  %v1659_v56 = vld [vmem:[#allocation5 + $0x1c4] ss:$16 sps:$4 sm:$0xff]  }
  0x70   : > { %875 = vmatprep.subr.bf16.mxu0 %v1605_v17  ;;  %v1670_v57 = vld [vmem:[#allocation5 + $0x188] ss:$16 sps:$4 sm:$0xff]   ;;  %v1671_v58 = vld [vmem:[#allocation5 + $0x1ac] ss:$16 sps:$4 sm:$0xff]   ;;  %v1663_v59 = vld [vmem:[#allocation5 + $0x1c0] ss:$16 sps:$4 sm:$0xff]  }
  0x71   : > { %915 = vmatpush1.bf16.msra.mxu1 %v1622_v22  ;;  %v1665_v60 = vld [vmem:[#allocation5 + $0x1e4] ss:$16 sps:$4 sm:$0xff]   ;;  %v1673_v61 = vld [vmem:[#allocation5 + $0x1a8] ss:$16 sps:$4 sm:$0xff]   ;;  %v1674_v62 = vld [vmem:[#allocation5 + $0x1cc] ss:$16 sps:$4 sm:$0xff]  }
  0x72   : > { %916 = vmatprep.subr.bf16.mxu1 %v1625_v23  ;;  %v1669_v0 = vld [vmem:[#allocation5 + $0x1e0] ss:$16 sps:$4 sm:$0xff]   ;;  %v1676_v1 = vld [vmem:[#allocation5 + $0x1c8] ss:$16 sps:$4 sm:$0xff]   ;;  %v1677_v2 = vld [vmem:[#allocation5 + $0x1ec] ss:$16 sps:$4 sm:$0xff]  }
  0x73   : > { %876 = vmatpush1.bf16.msra.mxu0 %v1609_v20  ;;  %v1679_v4 = vld [vmem:[#allocation5 + $0x1e8] ss:$16 sps:$4 sm:$0xff]   ;;  %v1938_v5 = vmov -inf   ;;  %v1939_v6 = vmov 0.0   ;;  %v526_v8 = vshrl.u32 %v525_v7, 7 }
  0x74   : > { %877 = vmatprep.subr.bf16.mxu0 %v1611_v21  ;;  %975 = vst.msk [vmem:[#allocation3] sm:$0xff] %vm974_vm0, %v1938_v5  ;;  %976 = vst.msk [vmem:[#allocation4] sm:$0xff] %vm974_vm0, %v1939_v6  ;;  %v523_v10 = vld [vmem:[%s2274_s4] sm:$0xf] }
  0x75   : > { %917 = vmatpush1.bf16.msra.mxu1 %v1628_v26  ;;  %v527_v9 = vsub.s32 0, %v526_v8  ;;  %v531_v11 = vsub.s32 1, %v526_v8  ;;  %v539_v14 = vsub.s32 3, %v526_v8 }
  0x76   : > { %918 = vmatprep.subr.bf16.mxu1 %v1631_v27 }
  0x77   : > { %878 = vmatpush1.bf16.msra.mxu0 %v1615_v24  ;;  %v528_v12 = vrot.slane %v523_v10, %v527_v9  ;;  %v532_v13 = vrot.slane %v523_v10, %v531_v11  ;;  %v540_v22 = vrot.slane %v523_v10, %v539_v14  ;;  %v535_v24 = vsub.s32 2, %v526_v8 }
  0x78   : > { %879 = vmatprep.subr.bf16.mxu0 %v1617_v25 }
  0x79   : > { %919 = vmatpush1.bf16.msra.mxu1 %v1634_v30 }
  0x7a   : > { %920 = vmatprep.subr.bf16.mxu1 %v1637_v31 }
  0x7b   : > { %880 = vmatpush1.bf16.msra.mxu0 %v1621_v28 }
  0x7c   : > { %881 = vmatprep.subr.bf16.mxu0 %v1623_v29  ;;  %v536_v29 = vrot.slane %v523_v10, %v535_v24 }
  0x7d   : > { %921 = vmatpush1.bf16.msra.mxu1 %v1640_v34 }
  0x7e   : > { %922 = vmatprep.subr.bf16.mxu1 %v1643_v35 }
  0x7f   : > { %882 = vmatpush1.bf16.msra.mxu0 %v1627_v32 }
  0x80   : > { %883 = vmatprep.subr.bf16.mxu0 %v1629_v33 }
  0x81   : > { %923 = vmatpush1.bf16.msra.mxu1 %v1646_v38 }
  0x82   : > { %924 = vmatprep.subr.bf16.mxu1 %v1649_v39  ;;  %v456_v39 = vld [vmem:[%s2272_s2] sm:$0xff] }
  0x83   : > { %884 = vmatpush1.bf16.msra.mxu0 %v1633_v36 }
  0x84   : > { %885 = vmatprep.subr.bf16.mxu0 %v1635_v37 }
  0x85   : > { %925 = vmatpush1.bf16.msra.mxu1 %v1652_v44 }
  0x86   : > { %926 = vmatprep.subr.bf16.mxu1 %v1655_v45 }
  0x87   : > { %886 = vmatpush1.bf16.msra.mxu0 %v1639_v41 }
  0x88   : > { %887 = vmatprep.subr.bf16.mxu0 %v1641_v43 }
  0x89   : > { %927 = vmatpush1.bf16.msra.mxu1 %v1658_v48 }
  0x8a   : > { %928 = vmatprep.subr.bf16.mxu1 %v1661_v49 }
  0x8b   : > { %888 = vmatpush1.bf16.msra.mxu0 %v1645_v46 }
  0x8c   : > { %889 = vmatprep.subr.bf16.mxu0 %v1647_v47 }
  0x8d   : > { %929 = vmatpush1.bf16.msra.mxu1 %v1664_v53 }
  0x8e   : > { %930 = vmatprep.subr.bf16.mxu1 %v1667_v54 }
  0x8f   : > { %890 = vmatpush1.bf16.msra.mxu0 %v1651_v51 }
  0x90   : > { %891 = vmatprep.subr.bf16.mxu0 %v1653_v52 }
  0x91   : > { %931 = vmatpush1.bf16.msra.mxu1 %v1670_v57 }
  0x92   : > { %932 = vmatprep.subr.bf16.mxu1 %v1671_v58 }
  0x93   : > { %892 = vmatpush1.bf16.msra.mxu0 %v1657_v55 }
  0x94   : > { %893 = vmatprep.subr.bf16.mxu0 %v1659_v56 }
  0x95   : > { %933 = vmatpush1.bf16.msra.mxu1 %v1673_v61 }
  0x96   : > { %934 = vmatprep.subr.bf16.mxu1 %v1674_v62 }
  0x97   : > { %894 = vmatpush1.bf16.msra.mxu0 %v1663_v59 }
  0x98   : > { %895 = vmatprep.subr.bf16.mxu0 %v1665_v60 }
  0x99   : > { %935 = vmatpush1.bf16.msra.mxu1 %v1676_v1 }
  0x9a   : > { %936 = vmatprep.subr.bf16.mxu1 %v1677_v2 }
  0x9b   : > { %896 = vmatpush1.bf16.msra.mxu0 %v1669_v0 }
  0x9d   : > { %937 = vmatpush1.bf16.msra.mxu1 %v1679_v4 }
  0x9e   : > { %898 = vmatmul.mubr.bf16.vlgmr.msra.gmra.mrb[0].mxu0 %v457_v3 }
  0xa0   : > { %939 = vmatmul.mubr.bf16.vlgmr.msra.gmra.mrb[0].mxu1 %v457_v3 }
 0x171   : > { %v899_v15 = vpop.f32.mrb[0].mxu0 }
 0x172   : > { %v900_v16 = vadd.f32 %v899_v15, %v528_v12  ;;  %v901_v17 = vpop.f32.mrb[1].mxu0 }
 0x173   : > { %v902_v18 = vadd.f32 %v901_v17, %v532_v13  ;;  %v903_v19 = vpop.f32.mrb[2].mxu0  ;;  %v940_v25 = vpop.f32.mrb[0].mxu1 }
 0x174   : > { %v1458_v20 = vmul.f32 -1.442695, %v900_v16  ;;  %v904_v21 = vpop.f32.mrb[3].mxu0  ;;  %v942_v26 = vpop.f32.mrb[1].mxu1  ;;  %v941_v32 = vadd.f32 %v940_v25, %v536_v29 }
 0x175   : > { %v1459_v23 = vmul.f32 -1.442695, %v902_v18  ;;  %v943_v27 = vadd.f32 %v942_v26, %v540_v22  ;;  %v944_v28 = vpop.f32.mrb[2].mxu1 }
 0x176   : > { %1682 = vpow2.f32 %v1458_v20  ;;  %v945_v30 = vpop.f32.mrb[3].mxu1 }
 0x177   : > { %1684 = vpow2.f32 %v1459_v23  ;;  %v1460_v31 = vmul.f32 -1.442695, %v943_v27 }
 0x179   : > { %1686 = vpow2.f32 %v1460_v31 }
 0x17a   : > { %1688 = vtanh.f32 %v941_v32 }
 0x180   : > { %v1683_v33 = vpop.eup %1682 }
 0x181   : > { %v1685_v34 = vpop.eup %1684  ;;  %v950_v35 = vadd.f32 1.0, %v1683_v33 }
 0x182   : > { %v956_v36 = vadd.f32 1.0, %v1685_v34 }
 0x183   : > { %1690 = vrcp.f32 %v950_v35  ;;  %v1687_v37 = vpop.eup %1686 }
 0x184   : > { %1692 = vrcp.f32 %v956_v36  ;;  %v1689_v38 = vpop.eup %1688  ;;  %v963_v41 = vadd.f32 1.0, %v1687_v37 }
 0x186   : > { %1694 = vrcp.f32 %v963_v41 }
 0x18d   : > { %v1691_v40 = vpop.eup %1690 }
 0x18e   : > { %v1693_v42 = vpop.eup %1692  ;;  %v967_v43 = vmul.f32 %v1691_v40, %v1689_v38 }
 0x18f   : > { %v966_v44 = vmul.f32 %v1693_v42, %v456_v39 }
 0x190   : > { %v1695_v46 = vpop.eup %1694 }
 0x191   : > { %v968_v45 = vadd.f32 %v967_v43, %v966_v44 }
 0x193   : > { %1696 = vtanh.f32 %v968_v45  ;;  %973 = vst [vmem:[#allocation13] sm:$0xff] %v968_v45 }
 0x19d   : > { %v1697_v47 = vpop.eup %1696 }
 0x19e   : > { %v970_v48 = vmul.f32 %v1697_v47, %v1695_v46 }
 0x1a0   : > { %971 = vst [vmem:[#allocation2] sm:$0xff] %v970_v48  ;;  %972 = vst [vmem:[#allocation11] sm:$0xff] %v970_v48 }
 0x1a1 PF: > { %v1699_v49 = vld [vmem:[%s2133_s20 + $0x4] ss:$8 sps:$4 sm:$0xff]   ;;  %v1701_v50 = vld [vmem:[%s2133_s20] ss:$8 sps:$4 sm:$0xff]   ;;  %v1940_v51 = vmov 0   ;;  %v997_v4 = vlaneseq  ;;  %s1477_s19 = sshll.u32 %s1922_s12, 8 }
 0x1a2   : > { %1119 = vmatprep.mubr.bf16.mxu0 %v1940_v51  ;;  %1698 = vset.pattern.permute.xlu0 %v1940_v51  ;;  %v1702_v52 = vld [vmem:[%s2133_s20 + $0x14] ss:$8 sps:$4 sm:$0xff]   ;;  %v1704_v53 = vld [vmem:[%s2133_s20 + $0x10] ss:$8 sps:$4 sm:$0xff]   ;;  %v1705_v54 = vld [vmem:[%s2133_s20 + $0x24] ss:$8 sps:$4 sm:$0xff]  }
 0x1a3   : > { %1087 = vmatprep.subr.bf16.mxu0 %v1699_v49  ;;  %v1707_v55 = vld [vmem:[%s2133_s20 + $0x20] ss:$8 sps:$4 sm:$0xff]   ;;  %v1708_v56 = vld [vmem:[%s2133_s20 + $0x34] ss:$8 sps:$4 sm:$0xff]   ;;  %v1710_v57 = vld [vmem:[%s2133_s20 + $0x30] ss:$8 sps:$4 sm:$0xff]  }
 0x1a4   : > { %1088 = vmatpush1.bf16.msra.mxu0 %v1701_v50  ;;  %v1711_v58 = vld [vmem:[%s2133_s20 + $0x44] ss:$8 sps:$4 sm:$0xff]   ;;  %v1713_v59 = vld [vmem:[%s2133_s20 + $0x40] ss:$8 sps:$4 sm:$0xff]   ;;  %v1714_v60 = vld [vmem:[%s2133_s20 + $0x54] ss:$8 sps:$4 sm:$0xff]  }
 0x1a5   : > { %1089 = vmatprep.subr.bf16.mxu0 %v1702_v52  ;;  %v1716_v61 = vld [vmem:[%s2133_s20 + $0x50] ss:$8 sps:$4 sm:$0xff]   ;;  %v1717_v62 = vld [vmem:[%s2133_s20 + $0x64] ss:$8 sps:$4 sm:$0xff]   ;;  %v1719_v63 = vld [vmem:[%s2133_s20 + $0x60] ss:$8 sps:$4 sm:$0xff]  }
 0x1a6   : > { %v1720_v0 = vld [vmem:[%s2133_s20 + $0x74] ss:$8 sps:$4 sm:$0xff]   ;;  %v1722_v1 = vld [vmem:[%s2133_s20 + $0x70] ss:$8 sps:$4 sm:$0xff]   ;;  %v998_v5 = vshrl.u32 %v997_v4, 7  ;;  %s1157_s16 = sshra.s32 %s1477_s19, 7 }
 0x1a7   : > { %v977_v2 = vld [vmem:[#allocation2] sm:$0xff]  ;;  %s1478_s18 = sshll.u32 %s1157_s16, 3  ;;  %v1128_v18 = vld [vmem:[#allocation3] sm:$0xff]  ;;  %vm1153_vm1 = vcmask 7168   ;;  %v1133_v32 = vld [vmem:[#allocation4] sm:$0xff]  ;;  %p1479_p6 = scmp.ne.s32.totalorder %s1922_s12, 1 }
 0x1a8   : > { %1090 = vmatpush1.bf16.msra.mxu0 %v1704_v53  ;;  %v978_v3 = vpack.c.bf16 %v977_v2, %v977_v2  ;;  %v999_v6 = vsub.s32 0, %v998_v5  ;;  %v995_v7 = vld [vmem:[%s446_s23] sm:$0x3]  ;;  %v1003_v8 = vsub.s32 1, %v998_v5  ;;  %s1160_s20 = scalar_lea.vmem [#allocation10], %s1478_s18  ;;  %v1941_v37 = vmov (!%p1479_p6), 0  }
 0x1a9   : > { %1091 = vmatprep.subr.bf16.mxu0 %v1705_v54 }
 0x1aa   : > { %v1000_v9 = vrot.slane %v995_v7, %v999_v6  ;;  %v1004_v10 = vrot.slane %v995_v7, %v1003_v8 }
 0x1ac   : > { %1092 = vmatpush1.bf16.msra.mxu0 %v1707_v55 }
 0x1ad   : > { %1093 = vmatprep.subr.bf16.mxu0 %v1708_v56 }
 0x1b0   : > { %1094 = vmatpush1.bf16.msra.mxu0 %v1710_v57 }
 0x1b1   : > { %1095 = vmatprep.subr.bf16.mxu0 %v1711_v58 }
 0x1b4   : > { %1096 = vmatpush1.bf16.msra.mxu0 %v1713_v59 }
 0x1b5   : > { %1097 = vmatprep.subr.bf16.mxu0 %v1714_v60 }
 0x1b8   : > { %1098 = vmatpush1.bf16.msra.mxu0 %v1716_v61 }
 0x1b9   : > { %1099 = vmatprep.subr.bf16.mxu0 %v1717_v62 }
 0x1bc   : > { %1100 = vmatpush1.bf16.msra.mxu0 %v1719_v63 }
 0x1bd   : > { %1101 = vmatprep.subr.bf16.mxu0 %v1720_v0 }
 0x1c0   : > { %1102 = vmatpush1.bf16.msra.mxu0 %v1722_v1 }
 0x1c3   : > { %1120 = vmatmul.mubr.bf16.vlgmr.msra.gmra.mrb[0].mxu0 %v978_v3 }
 0x296   : > { %v1121_v11 = vpop.f32.mrb[0].mxu0 }
 0x297   : > { %v1122_v12 = vadd.f32 %v1121_v11, %v1000_v9  ;;  %v1123_v13 = vpop.f32.mrb[1].mxu0 }
 0x298   : > { %v1124_v14 = vadd.f32 %v1123_v13, %v1004_v10  ;;  %v1125_v15 = vpop.f32.mrb[2].mxu0 }
 0x299   : > { %1161 = vst [vmem:[%s1160_s20] sm:$0xff] %v1122_v12  ;;  %v1126_v16 = vpop.f32.mrb[3].mxu0 }
 0x29a   : > { %1162 = vst [vmem:[%s1160_s20 + $0x8] sm:$0xff] %v1124_v14  ;;  %v1129_v17 = vmax.f32 %v1122_v12, %v1124_v14 }
 0x29c   : > { %1130 = vmax.xlane.f32.xlu0 %v1129_v17 }
 0x2a1   : > { %v1172_v42 = vld [vmem:[#allocation10] sm:$0xff] (!%p1479_p6)  ;;  %v1173_v43 = vld [vmem:[#allocation10 + $0x8] sm:$0xff] (!%p1479_p6)  ;;  %v1174_v44 = vld [vmem:[#allocation10 + $0x10] sm:$0xff] (!%p1479_p6) }
 0x2a2   : > { %v1175_v45 = vld [vmem:[#allocation10 + $0x18] sm:$0xff] (!%p1479_p6) }
 0x329   : > { %v1131_v19 = vpop.xlane.xlu0 %1130 }
 0x32a   : > { %v1132_v20 = vmax.f32 %v1128_v18, %v1131_v19 }
 0x32c   : > { %v1134_v21 = vsub.f32 %v1128_v18, %v1132_v20  ;;  %1155 = vst.msk [vmem:[#allocation3] sm:$0xff] %vm1153_vm1, %v1132_v20  ;;  %1140 = vperm.xlu0 %1698, %v1132_v20  }
 0x32e   : > { %v1135_v30 = vmul.f32 1.442695, %v1134_v21 }
 0x330   : > { %1729 = vset.pattern.permute.xlu0 (!%p1479_p6), %v1941_v37 }
 0x333   : > { %v1167_v39 = vld [vmem:[#allocation3] sm:$0xff] (!%p1479_p6) }
 0x3ab   : > { %v1141_v22 = vpop.permute.xlu0 %1140 }
 0x3ac   : > { %v1143_v23 = vsub.f32 %v1122_v12, %v1141_v22  ;;  %v1144_v24 = vsub.f32 %v1124_v14, %v1141_v22 }
 0x3ae   : > { %v1145_v25 = vmul.f32 1.442695, %v1143_v23  ;;  %v1147_v26 = vmul.f32 1.442695, %v1144_v24 }
 0x3b0   : > { %1723 = vpow2.f32 %v1145_v25 }
 0x3b1   : > { %1725 = vpow2.f32 %v1147_v26 }
 0x3b2   : > { %1727 = vpow2.f32 %v1135_v30 }
 0x3ba   : > { %v1724_v27 = vpop.eup %1723 }
 0x3bb   : > { %v1726_v28 = vpop.eup %1725 }
 0x3bc   : > { %v1149_v29 = vadd.f32 %v1726_v28, %v1724_v27  ;;  %v1728_v31 = vpop.eup %1727 }
 0x3bd   : > { %v1137_v33 = vmul.f32 %v1728_v31, %v1133_v32 }
 0x3be   : > { %1150 = vadd.xlane.f32.xlu1 %v1149_v29 }
 0x448   : > { %1166 = sbr.rel (%p1479_p6) target bundleno = 1257 (0x4e9), region = 64 }
 0x44b   : > { %v1151_v34 = vpop.xlane.xlu1 %1150 }
 0x44c   : > { %v1152_v35 = vadd.f32 %v1151_v34, %v1137_v33 }
 0x44e   : > { %1154 = vst.msk [vmem:[#allocation4] sm:$0xff] %vm1153_vm1, %v1152_v35 }
 0x455   : > { %v1168_v36 = vld [vmem:[#allocation4] sm:$0xff] }
 0x456   : > { %1730 = vlog2.f32 %v1168_v36 }
 0x460   : > { %v1731_v38 = vpop.eup %1730 }
 0x461   : > { %v1170_v40 = vmul.f32 0.6931472, %v1731_v38 }
 0x463   : > { %v1171_v41 = vadd.f32 %v1170_v40, %v1167_v39 }
 0x465   : > { %1178 = vperm.xlu0 %1729, %v1171_v41  }
 0x4e4   : > { %v1179_v46 = vpop.permute.xlu0 %1178 }
 0x4e5   : > { %v1181_v47 = vsub.f32 %v1172_v42, %v1179_v46  ;;  %v1182_v48 = vsub.f32 %v1173_v43, %v1179_v46  ;;  %v1183_v49 = vsub.f32 %v1174_v44, %v1179_v46  ;;  %v1184_v50 = vsub.f32 %v1175_v45, %v1179_v46 }
 0x4e7   : > { %1185 = vst [vmem:[#allocation10] sm:$0xff] %v1181_v47  ;;  %1186 = vst [vmem:[#allocation10 + $0x8] sm:$0xff] %v1182_v48 }
 0x4e8   : > { %1187 = vst [vmem:[#allocation10 + $0x10] sm:$0xff] %v1183_v49  ;;  %1188 = vst [vmem:[#allocation10 + $0x18] sm:$0xff] %v1184_v50 }
 0x4e9 PF: > { %s2302_s12 = sadd.s32 4294967295, %s1930_s14   ;;  %s1942_s23 = smov [#allocation11]  }
 0x4ea   : > { %p2186_p9 = scmp.eq.s32.totalorder %s2302_s12, 1  ;;  %s1212_s17 = sshll.u32 %s1942_s23, 4  ;;  %s1213_s17 = int_to_ptr.vmem [resolvable:$true] %s1212_s17 }
 0x4eb   : > { %s1790_s21 = scalar_lea.vmem %s1213_s17, 128  ;;  %p1797_p8 = scmp.lt.s32.totalorder %s1213_s17, %s1213_s17 }
 0x4ec   : > { %p1791_p11 = scmp.ne.s32.totalorder %s1213_s17, %s1790_s21  ;;  %p1798_p13 = scmp.lt.s32.totalorder %s1790_s21, %s1790_s21 }
 0x4ee   : > { %p1792_p3 = pnand %p1791_p11, %p2186_p9  ;;  %p1799_p1 = por %p1798_p13, %p1797_p8 }
 0x4f0   : > { %p1793_p7 = pneg %p1792_p3 }
 0x4f2   : > { %p1800_p2 = pnand %p1799_p1, %p1793_p7 }
 0x4f4   : > { %1803 = shalt.err (!%p1800_p2)
}
 0x4f5   : > { %s1804_s15 = scalar_lea.hbm %s2278_s8, 128 }
 0x4f6   : > { %p1805_p12 = scmp.ne.s32.totalorder %s2278_s8, %s1804_s15  ;;  %p1810_p10 = scmp.lt.u32.totalorder %s1804_s15, %s2278_s8 }
 0x4f8   : > { %p1806_p0 = pnand %p1805_p12, %p2186_p9 }
 0x4fa   : > { %p1807_p4 = pneg %p1806_p0 }
 0x4fc   : > { %p1812_p5 = pnand %p1810_p10, %p1807_p4 }
 0x4fe   : > { %1815 = shalt.err (!%p1812_p5)
}
 0x4ff   : > { %1498 = dma.vmem_to_hbm [thread:$0]  (%p2186_p9), %s1213_s17, 128, %s2278_s8, [#allocation12]  }
 0x500   : > { %s1943_s16 = smov [#allocation10]   ;;  %s1944_s20 = smov [#allocation13]  }
 0x501   : > { %s1199_s18 = sshll.u32 %s1943_s16, 4  ;;  %s1225_s12 = sshll.u32 %s1944_s20, 4  ;;  %s1200_s18 = int_to_ptr.vmem [resolvable:$true] %s1199_s18  ;;  %s1226_s12 = int_to_ptr.vmem [resolvable:$true] %s1225_s12 }
 0x502   : > { %s1816_s23 = scalar_lea.vmem %s1200_s18, 512  ;;  %p1823_p7 = scmp.lt.s32.totalorder %s1200_s18, %s1200_s18 }
 0x503   : > { %p1817_p6 = scmp.ne.s32.totalorder %s1200_s18, %s1816_s23  ;;  %p1824_p8 = scmp.lt.s32.totalorder %s1816_s23, %s1816_s23 }
 0x505   : > { %p1818_p11 = pnand %p1817_p6, %p2186_p9  ;;  %p1825_p13 = por %p1824_p8, %p1823_p7 }
 0x507   : > { %p1819_p3 = pneg %p1818_p11 }
 0x509   : > { %p1826_p1 = pnand %p1825_p13, %p1819_p3 }
 0x50b   : > { %1829 = shalt.err (!%p1826_p1)
}
 0x50c   : > { %s1830_s17 = scalar_lea.hbm %s2277_s7, 512 }
 0x50d   : > { %p1831_p2 = scmp.ne.s32.totalorder %s2277_s7, %s1830_s17  ;;  %p1836_p4 = scmp.lt.u32.totalorder %s1830_s17, %s2277_s7 }
 0x50f   : > { %p1832_p12 = pnand %p1831_p2, %p2186_p9 }
 0x511   : > { %p1833_p0 = pneg %p1832_p12 }
 0x513   : > { %p1838_p10 = pnand %p1836_p4, %p1833_p0 }
 0x515   : > { %1841 = shalt.err (!%p1838_p10)
}
 0x516   : > { %1496 = dma.vmem_to_hbm [thread:$0]  (%p2186_p9), %s1200_s18, 512, %s2277_s7, [#allocation7]  }
 0x517   : > { %s1842_s26 = scalar_lea.vmem %s1226_s12, 128  ;;  %p1849_p3 = scmp.lt.s32.totalorder %s1226_s12, %s1226_s12 }
 0x518   : > { %p1843_p5 = scmp.ne.s32.totalorder %s1226_s12, %s1842_s26  ;;  %p1850_p7 = scmp.lt.s32.totalorder %s1842_s26, %s1842_s26 }
 0x51a   : > { %p1844_p6 = pnand %p1843_p5, %p2186_p9  ;;  %p1851_p8 = por %p1850_p7, %p1849_p3 }
 0x51c   : > { %p1845_p11 = pneg %p1844_p6 }
 0x51e   : > { %p1852_p13 = pnand %p1851_p8, %p1845_p11 }
 0x520   : > { %1855 = shalt.err (!%p1852_p13)
}
 0x521   : > { %s2304_s20 = sld [smem:[#allocation19_spill]] }
 0x527   : > { %s1856_s23 = scalar_lea.hbm %s2304_s20, 128 }
 0x528   : > { %p1857_p1 = scmp.ne.s32.totalorder %s2304_s20, %s1856_s23  ;;  %p1862_p0 = scmp.lt.u32.totalorder %s1856_s23, %s2304_s20 }
 0x52a   : > { %p1858_p2 = pnand %p1857_p1, %p2186_p9 }
 0x52c   : > { %p1859_p12 = pneg %p1858_p2 }
 0x52e   : > { %p1864_p4 = pnand %p1862_p0, %p1859_p12 }
 0x530   : > { %1867 = shalt.err (!%p1864_p4)
}
 0x531   : > { %1500 = dma.vmem_to_hbm [thread:$0]  (%p2186_p9), %s1226_s12, 128, %s2304_s20, [#allocation12]  }
 0x532   : > { %1901 = dma.done.wait (%p2186_p9), [#allocation7], 512  }
 0x533   : > { %1903 = vsyncadd (%p2186_p9), [#allocation7], 4294966784 }
 0x534   : > { %1905 = dma.done.wait (%p2186_p9), [#allocation12], 256  }
 0x535   : > { %1907 = vsyncadd (%p2186_p9), [#allocation12], 4294967040 }
 0x536 PF: > { %s26_s14 = sadd.s32 1, %s1930_s14   ;;  %s2305_s30 = smov %s1914_s10 }
 0x537   : > { %p23_p10 = scmp.ge.s32.totalorder %s26_s14, 4   ;;  %s2306_s10 = smov %s1918_s11 }
 0x538   : > { %s2307_s11 = smov %s2095_s24  ;;  %s2308_s12 = smov %s1926_s13 }
 0x539   : > { %s2309_s13 = smov %s2311_s28  ;;  %25 = sbr.rel (!%p23_p10) target bundleno = 10 (0xa), region = 130 }
 0x540   :  { %1246 = vsyncpa [#allocation6], 1 }
 0x541   :  { %1248 = vsyncpa [#allocation6 + $0x1], 1 }
 0x542   :  { %1249 = vsyncpa [#allocation9], 1 }
 0x543   :  { %1251 = vsyncpa [#allocation9 + $0x1], 1 }
 0x544   :  { %1252 = vsyncpa [#allocation7], 1 }
 0x545   :  { %1254 = vsyncpa [#allocation7 + $0x1], 1 }
 0x546   :  { %1255 = vsyncpa [#allocation12], 1 }

</bundles_post_ra>
